<compile_context>
chip_gen: v6e
topology: v6e:2x2x1
jax: 0.10.0
libtpu: 0.0.40
codegen_flags: <defaults>
</compile_context>

<pallas_src>
import functools
import math

import jax
import jax.numpy as jnp
from jax import lax
from jax.experimental import pallas as pl
from jax.experimental.pallas import tpu as pltpu


def _attn_group_kernel(x_ref, wq_ref, wk_ref, wv_ref, b3_ref, wp_ref, bp_ref,
                       o_ref, acc_ref, *, block_q, group_size, head_dim):
    """One (batch, q-tile, head-group) grid step.

    Projects q/k/v for G heads at full MXU width, runs per-head non-causal
    softmax-attention, projects the group's (TQ, G*hd) output through its
    slice of Wproj and accumulates into acc_ref; writes o_ref on the last
    head group."""
    hg = pl.program_id(2)
    n_groups = pl.num_programs(2)
    ghd = group_size * head_dim

    xkv = x_ref[0]                                   # (T, C) -- full KV rows
    q_start = pl.multiple_of(pl.program_id(1) * block_q, block_q)
    xq = x_ref[0, pl.ds(q_start, block_q), :]        # (TQ, C) subset of xkv
    mm_dt = xkv.dtype                                # MXU input dtype

    b3 = b3_ref[0]                                   # (1, 3*ghd) packed biases
    bq = b3[:, 0:ghd]
    bk = b3[:, ghd:2 * ghd]
    bv = b3[:, 2 * ghd:3 * ghd]

    # Grouped projections (f32 accumulation).  1/sqrt(hd) is already folded
    # into Wq / bq on the host, so no in-kernel scale multiply.
    q = jnp.dot(xq, wq_ref[0], preferred_element_type=jnp.float32) + bq   # (TQ, ghd)
    k = jnp.dot(xkv, wk_ref[0], preferred_element_type=jnp.float32) + bk  # (T,  ghd)
    v = jnp.dot(xkv, wv_ref[0], preferred_element_type=jnp.float32) + bv  # (T,  ghd)

    # Per-head attention within the group (static unroll; group_size is a
    # compile-time constant).  Non-causal, matching the PyTorch module.
    ys = []
    for h in range(group_size):
        lo, hi = h * head_dim, (h + 1) * head_dim
        qh = q[:, lo:hi].astype(mm_dt)               # (TQ, hd)
        kh = k[:, lo:hi].astype(mm_dt)               # (T,  hd)
        vh = v[:, lo:hi].astype(mm_dt)               # (T,  hd)
        # Scores: contract the last dims directly -- no explicit transpose.
        s = lax.dot_general(qh, kh, (((1,), (1,)), ((), ())),
                            preferred_element_type=jnp.float32)           # (TQ, T)
        m = jnp.max(s, axis=-1, keepdims=True)
        p = jnp.exp(s - m)
        l = jnp.sum(p, axis=-1, keepdims=True)
        # Deferred normalization: scale the (TQ, hd) PV result instead of the
        # (TQ, T) probabilities; exact reciprocal (only TQ rows).
        yh = jnp.dot(p.astype(mm_dt), vh, preferred_element_type=jnp.float32)
        ys.append(yh * pl.reciprocal(l))             # (TQ, hd)
    y = jnp.concatenate(ys, axis=-1) if group_size > 1 else ys[0]         # (TQ, ghd)

    # This group's slice of the output projection: full-width K = ghd.
    part = jnp.dot(y.astype(mm_dt), wp_ref[0],
                   preferred_element_type=jnp.float32)                    # (TQ, C)

    @pl.when(hg == 0)
    def _():
        acc_ref[...] = jnp.zeros_like(acc_ref)

    acc_ref[...] += part

    @pl.when(hg == n_groups - 1)
    def _():
        # Single lane-dense (TQ, C) store.
        o_ref[0] = (acc_ref[...] + bp_ref[...]).astype(o_ref.dtype)


def _pick_block_q(T):
    # Prefer n_q == 1 (no K/V re-projection across q tiles) for moderate T;
    # otherwise the largest tile that divides T.
    if T <= 1024:
        return T
    for cand in (1024, 512, 256, 128):
        if T % cand == 0:
            return cand
    return T


def _pick_group_size(n_head, head_dim, target_ghd=256):
    # Largest divisor of n_head such that group width <= ~256 lanes.
    g = 1
    for cand in range(1, n_head + 1):
        if n_head % cand == 0 and cand * head_dim <= max(head_dim, target_ghd):
            g = cand
    return g


def _vmem_limit_bytes(estimate):
    cap = 64 * 1024 * 1024
    try:
        cap = int(pltpu.get_tpu_info().vmem_capacity_bytes)
    except Exception:
        pass
    # Generous but bounded: big tiles on 128 MiB parts, headroom on v7x.
    return int(min(max(32 * 1024 * 1024, 2 * estimate), int(0.9 * cap)))


def self_attention(x, wqkv, bqkv, wproj, bproj, *, n_head,
                   block_q=None, group_size=None):
    """x: (B, T, C); wqkv: (C, 3C); bqkv: (1, 3C); wproj: (C, C); bproj: (1, C).
    Weights stored transposed vs. torch.nn.Linear, i.e. y = x @ W + b."""
    B, T, C = x.shape
    assert C % n_head == 0
    hd = C // n_head
    scale = 1.0 / math.sqrt(hd)

    if group_size is None:
        group_size = _pick_group_size(n_head, hd)
    assert n_head % group_size == 0
    n_groups = n_head // group_size
    ghd = group_size * hd

    if block_q is None:
        block_q = _pick_block_q(T)
    assert T % block_q == 0
    n_q = T // block_q

    # Host-side relayout (one-time; fuses under jit).  Scale folded into Wq/bq.
    wq_f, wk_f, wv_f = jnp.split(wqkv, 3, axis=1)          # each (C, C)
    bq_f, bk_f, bv_f = jnp.split(bqkv, 3, axis=1)          # each (1, C)
    wq_f = wq_f * scale
    bq_f = bq_f * scale

    def group_w(w):                                         # (C, C) -> (HG, C, ghd)
        return w.reshape(C, n_groups, ghd).transpose(1, 0, 2)

    def group_b(b):                                         # (1, C) -> (HG, 1, ghd)
        return b.reshape(n_groups, 1, ghd)

    wq_g, wk_g, wv_g = group_w(wq_f), group_w(wk_f), group_w(wv_f)
    b3_g = jnp.concatenate([group_b(bq_f), group_b(bk_f), group_b(bv_f)],
                           axis=-1)                         # (HG, 1, 3*ghd)
    wp_g = wproj.reshape(n_groups, ghd, C)                  # (HG, ghd, C)

    kernel = functools.partial(_attn_group_kernel, block_q=block_q,
                               group_size=group_size, head_dim=hd)
    grp_spec = lambda shape: pl.BlockSpec(shape, lambda b, qi, hg: (hg, 0, 0))

    itemsize = jnp.dtype(x.dtype).itemsize
    est = (2 * T * C * itemsize                              # x block (double-buffered)
           + 2 * (4 * C * ghd + 3 * ghd + C) * itemsize      # one group's weights/biases
           + block_q * C * 4                                 # f32 accumulator scratch
           + 3 * block_q * T * 4                             # score/exp temporaries
           + 2 * block_q * C * itemsize)                     # output tile

    return pl.pallas_call(
        kernel,
        out_shape=jax.ShapeDtypeStruct((B, T, C), x.dtype),
        grid=(B, n_q, n_groups),
        in_specs=[
            # Single x input: q-tile is sliced from this block in-kernel.
            # Index only changes with b -> re-fetched once per batch.
            pl.BlockSpec((1, T, C), lambda b, qi, hg: (b, 0, 0)),
            grp_spec((1, C, ghd)),          # Wq group (scale folded in)
            grp_spec((1, C, ghd)),          # Wk group
            grp_spec((1, C, ghd)),          # Wv group
            grp_spec((1, 1, 3 * ghd)),      # packed [bq|bk|bv] group biases
            grp_spec((1, ghd, C)),          # Wproj group rows
            pl.BlockSpec((1, C), lambda b, qi, hg: (0, 0)),  # bproj
        ],
        out_specs=pl.BlockSpec((1, block_q, C), lambda b, qi, hg: (b, qi, 0)),
        scratch_shapes=[pltpu.VMEM((block_q, C), jnp.float32)],
        compiler_params=pltpu.CompilerParams(
            # B and q-tiles are independent (pipelining / megacore sharding);
            # head groups are the output-accumulation axis.
            dimension_semantics=("parallel", "parallel", "arbitrary"),
            vmem_limit_bytes=_vmem_limit_bytes(est),
        ),
    )(x, wq_g, wk_g, wv_g, b3_g, wp_g, bproj)


def _reference(x, wqkv, bqkv, wproj, bproj, n_head):
    B, T, C = x.shape
    hd = C // n_head
    qkv = x @ wqkv + bqkv[0]
    q, k, v = jnp.split(qkv, 3, axis=-1)
    q = q.reshape(B, T, n_head, hd).transpose(0, 2, 1, 3)
    k = k.reshape(B, T, n_head, hd).transpose(0, 2, 1, 3)
    v = v.reshape(B, T, n_head, hd).transpose(0, 2, 1, 3)
    s = jnp.einsum("bhqd,bhkd->bhqk", q, k) / math.sqrt(hd)
    p = jax.nn.softmax(s, axis=-1)
    y = jnp.einsum("bhqk,bhkd->bhqd", p, v)
    y = y.transpose(0, 2, 1, 3).reshape(B, T, C)
    return y @ wproj + bproj[0]


if __name__ == "__main__":
    # Small config consistent with the module: B=2, T=8, n_embd=32, n_head=4.
    B, T, C, n_head = 2, 8, 32, 4

    key = jax.random.PRNGKey(0)
    kx, k1, k2, k3, k4 = jax.random.split(key, 5)
    x = jax.random.normal(kx, (B, T, C), dtype=jnp.float32)

    # nn.Linear params (c_attn C->3C, c_proj C->C), stored transposed (in, out);
    # biases kept 2-D for TPU-friendly layout.
    wqkv = jax.random.normal(k1, (C, 3 * C), dtype=jnp.float32) * 0.02
    bqkv = jax.random.normal(k2, (1, 3 * C), dtype=jnp.float32) * 0.02
    wproj = jax.random.normal(k3, (C, C), dtype=jnp.float32) * 0.02
    bproj = jax.random.normal(k4, (1, C), dtype=jnp.float32) * 0.02

    out = self_attention(x, wqkv, bqkv, wproj, bproj, n_head=n_head)
    out = jax.block_until_ready(out)

    ref = _reference(x, wqkv, bqkv, wproj, bproj, n_head)
    assert out.shape == (B, T, C)
    # Exact reciprocal + f32 accumulation -> tight tolerance.
    err = float(jnp.max(jnp.abs(out - ref)))
    assert jnp.allclose(out, ref, atol=1e-4, rtol=1e-4), err
    print("KERNEL_OK")
</pallas_src>

<mosaic_0001>
module attributes {stable_mosaic.version = 11 : i64} {
  func.func @_attn_group_kernel(%arg0: i32, %arg1: i32, %arg2: i32, %arg3: memref<1x8x32xf32, #tpu.memory_space<vmem>>, %arg4: memref<1x32x32xf32, #tpu.memory_space<vmem>>, %arg5: memref<1x32x32xf32, #tpu.memory_space<vmem>>, %arg6: memref<1x32x32xf32, #tpu.memory_space<vmem>>, %arg7: memref<1x1x96xf32, #tpu.memory_space<vmem>>, %arg8: memref<1x32x32xf32, #tpu.memory_space<vmem>>, %arg9: memref<1x32xf32, #tpu.memory_space<vmem>>, %arg10: memref<1x8x32xf32, #tpu.memory_space<vmem>>, %arg11: memref<8x32xf32, #tpu.memory_space<vmem>>) attributes {dimension_semantics = [#tpu.dimension_semantics<parallel>, #tpu.dimension_semantics<parallel>, #tpu.dimension_semantics<arbitrary>], iteration_bounds = array<i64: 2, 1, 1>, scalar_prefetch = 0 : i64, scratch_operands = 1 : i64, tpu.core_type = #tpu.core_type<tc>, window_params = [{transform_indices = @transform_0, window_bounds = array<i64: 1, 8, 32>}, {transform_indices = @transform_1, window_bounds = array<i64: 1, 32, 32>}, {transform_indices = @transform_2, window_bounds = array<i64: 1, 32, 32>}, {transform_indices = @transform_3, window_bounds = array<i64: 1, 32, 32>}, {transform_indices = @transform_4, window_bounds = array<i64: 1, 1, 96>}, {transform_indices = @transform_5, window_bounds = array<i64: 1, 32, 32>}, {pipeline_mode = #tpu.pipeline_mode<synchronous>, transform_indices = @transform_6, window_bounds = array<i64: 1, 32>}, {transform_indices = @transform_7, window_bounds = array<i64: 1, 8, 32>}]} {
    %c0 = arith.constant 0 : index
    %c0_0 = arith.constant 0 : index
    %c0_1 = arith.constant 0 : index
    %0 = vector.load %arg3[%c0, %c0_0, %c0_1] : memref<1x8x32xf32, #tpu.memory_space<vmem>>, vector<1x8x32xf32>
    %1 = vector.shape_cast %0 : vector<1x8x32xf32> to vector<8x32xf32>
    %c8_i32 = arith.constant 8 : i32
    %2 = arith.muli %arg1, %c8_i32 : i32
    %3 = tpu.assume_multiple %2, 8 : i32
    %c0_2 = arith.constant 0 : index
    %4 = arith.index_cast %3 : i32 to index
    %c0_3 = arith.constant 0 : index
    %5 = vector.load %arg3[%c0_2, %4, %c0_3] : memref<1x8x32xf32, #tpu.memory_space<vmem>>, vector<1x8x32xf32>
    %6 = vector.shape_cast %5 : vector<1x8x32xf32> to vector<8x32xf32>
    %c0_4 = arith.constant 0 : index
    %c0_5 = arith.constant 0 : index
    %c0_6 = arith.constant 0 : index
    %7 = vector.load %arg7[%c0_4, %c0_5, %c0_6] : memref<1x1x96xf32, #tpu.memory_space<vmem>>, vector<1x1x96xf32>
    %8 = vector.shape_cast %7 : vector<1x1x96xf32> to vector<1x96xf32>
    %9 = vector.extract_strided_slice %8 {offsets = [0, 0], sizes = [1, 32], strides = [1, 1]} : vector<1x96xf32> to vector<1x32xf32>
    %10 = vector.extract_strided_slice %8 {offsets = [0, 32], sizes = [1, 32], strides = [1, 1]} : vector<1x96xf32> to vector<1x32xf32>
    %11 = vector.extract_strided_slice %8 {offsets = [0, 64], sizes = [1, 32], strides = [1, 1]} : vector<1x96xf32> to vector<1x32xf32>
    %c0_7 = arith.constant 0 : index
    %c0_8 = arith.constant 0 : index
    %c0_9 = arith.constant 0 : index
    %12 = vector.load %arg4[%c0_7, %c0_8, %c0_9] : memref<1x32x32xf32, #tpu.memory_space<vmem>>, vector<1x32x32xf32>
    %13 = vector.shape_cast %12 : vector<1x32x32xf32> to vector<32x32xf32>
    %cst = arith.constant dense<0.000000e+00> : vector<8x32xf32>
    %14 = tpu.matmul %6, %13, %cst {dimension_numbers = #tpu.dot_dimension_numbers<[1], [0], [0], [1], [0, 0, 1, 1], [], []>} : vector<8x32xf32>, vector<32x32xf32>, vector<8x32xf32> -> vector<8x32xf32>
    %15 = vector.broadcast %9 : vector<1x32xf32> to vector<8x32xf32>
    %16 = arith.addf %14, %15 : vector<8x32xf32>
    %c0_10 = arith.constant 0 : index
    %c0_11 = arith.constant 0 : index
    %c0_12 = arith.constant 0 : index
    %17 = vector.load %arg5[%c0_10, %c0_11, %c0_12] : memref<1x32x32xf32, #tpu.memory_space<vmem>>, vector<1x32x32xf32>
    %18 = vector.shape_cast %17 : vector<1x32x32xf32> to vector<32x32xf32>
    %cst_13 = arith.constant dense<0.000000e+00> : vector<8x32xf32>
    %19 = tpu.matmul %1, %18, %cst_13 {dimension_numbers = #tpu.dot_dimension_numbers<[1], [0], [0], [1], [0, 0, 1, 1], [], []>} : vector<8x32xf32>, vector<32x32xf32>, vector<8x32xf32> -> vector<8x32xf32>
    %20 = vector.broadcast %10 : vector<1x32xf32> to vector<8x32xf32>
    %21 = arith.addf %19, %20 : vector<8x32xf32>
    %c0_14 = arith.constant 0 : index
    %c0_15 = arith.constant 0 : index
    %c0_16 = arith.constant 0 : index
    %22 = vector.load %arg6[%c0_14, %c0_15, %c0_16] : memref<1x32x32xf32, #tpu.memory_space<vmem>>, vector<1x32x32xf32>
    %23 = vector.shape_cast %22 : vector<1x32x32xf32> to vector<32x32xf32>
    %cst_17 = arith.constant dense<0.000000e+00> : vector<8x32xf32>
    %24 = tpu.matmul %1, %23, %cst_17 {dimension_numbers = #tpu.dot_dimension_numbers<[1], [0], [0], [1], [0, 0, 1, 1], [], []>} : vector<8x32xf32>, vector<32x32xf32>, vector<8x32xf32> -> vector<8x32xf32>
    %25 = vector.broadcast %11 : vector<1x32xf32> to vector<8x32xf32>
    %26 = arith.addf %24, %25 : vector<8x32xf32>
    %27 = vector.extract_strided_slice %16 {offsets = [0, 0], sizes = [8, 8], strides = [1, 1]} : vector<8x32xf32> to vector<8x8xf32>
    %28 = vector.extract_strided_slice %21 {offsets = [0, 0], sizes = [8, 8], strides = [1, 1]} : vector<8x32xf32> to vector<8x8xf32>
    %29 = vector.extract_strided_slice %26 {offsets = [0, 0], sizes = [8, 8], strides = [1, 1]} : vector<8x32xf32> to vector<8x8xf32>
    %cst_18 = arith.constant dense<0.000000e+00> : vector<8x8xf32>
    %30 = tpu.matmul %27, %28, %cst_18 {dimension_numbers = #tpu.dot_dimension_numbers<[1], [1], [0], [0], [0, 0, 1, 0], [], []>} : vector<8x8xf32>, vector<8x8xf32>, vector<8x8xf32> -> vector<8x8xf32>
    %cst_19 = arith.constant dense<0xFF800000> : vector<8xf32>
    %31 = vector.multi_reduction <maximumf>, %30, %cst_19 [1] : vector<8x8xf32> to vector<8xf32>
    %32 = vector.shape_cast %31 : vector<8xf32> to vector<8x1xf32>
    %33 = vector.broadcast %32 : vector<8x1xf32> to vector<8x8xf32>
    %34 = arith.subf %30, %33 : vector<8x8xf32>
    %35 = math.exp %34 : vector<8x8xf32>
    %cst_20 = arith.constant dense<0.000000e+00> : vector<8xf32>
    %36 = vector.multi_reduction <add>, %35, %cst_20 [1] : vector<8x8xf32> to vector<8xf32>
    %37 = vector.shape_cast %36 : vector<8xf32> to vector<8x1xf32>
    %cst_21 = arith.constant dense<0.000000e+00> : vector<8x8xf32>
    %38 = tpu.matmul %35, %29, %cst_21 {dimension_numbers = #tpu.dot_dimension_numbers<[1], [0], [0], [1], [0, 0, 1, 1], [], []>} : vector<8x8xf32>, vector<8x8xf32>, vector<8x8xf32> -> vector<8x8xf32>
    %39 = tpu.reciprocal %37 : vector<8x1xf32> -> vector<8x1xf32>
    %40 = vector.broadcast %39 : vector<8x1xf32> to vector<8x8xf32>
    %41 = arith.mulf %38, %40 : vector<8x8xf32>
    %42 = vector.extract_strided_slice %16 {offsets = [0, 8], sizes = [8, 8], strides = [1, 1]} : vector<8x32xf32> to vector<8x8xf32>
    %43 = vector.extract_strided_slice %21 {offsets = [0, 8], sizes = [8, 8], strides = [1, 1]} : vector<8x32xf32> to vector<8x8xf32>
    %44 = vector.extract_strided_slice %26 {offsets = [0, 8], sizes = [8, 8], strides = [1, 1]} : vector<8x32xf32> to vector<8x8xf32>
    %cst_22 = arith.constant dense<0.000000e+00> : vector<8x8xf32>
    %45 = tpu.matmul %42, %43, %cst_22 {dimension_numbers = #tpu.dot_dimension_numbers<[1], [1], [0], [0], [0, 0, 1, 0], [], []>} : vector<8x8xf32>, vector<8x8xf32>, vector<8x8xf32> -> vector<8x8xf32>
    %cst_23 = arith.constant dense<0xFF800000> : vector<8xf32>
    %46 = vector.multi_reduction <maximumf>, %45, %cst_23 [1] : vector<8x8xf32> to vector<8xf32>
    %47 = vector.shape_cast %46 : vector<8xf32> to vector<8x1xf32>
    %48 = vector.broadcast %47 : vector<8x1xf32> to vector<8x8xf32>
    %49 = arith.subf %45, %48 : vector<8x8xf32>
    %50 = math.exp %49 : vector<8x8xf32>
    %cst_24 = arith.constant dense<0.000000e+00> : vector<8xf32>
    %51 = vector.multi_reduction <add>, %50, %cst_24 [1] : vector<8x8xf32> to vector<8xf32>
    %52 = vector.shape_cast %51 : vector<8xf32> to vector<8x1xf32>
    %cst_25 = arith.constant dense<0.000000e+00> : vector<8x8xf32>
    %53 = tpu.matmul %50, %44, %cst_25 {dimension_numbers = #tpu.dot_dimension_numbers<[1], [0], [0], [1], [0, 0, 1, 1], [], []>} : vector<8x8xf32>, vector<8x8xf32>, vector<8x8xf32> -> vector<8x8xf32>
    %54 = tpu.reciprocal %52 : vector<8x1xf32> -> vector<8x1xf32>
    %55 = vector.broadcast %54 : vector<8x1xf32> to vector<8x8xf32>
    %56 = arith.mulf %53, %55 : vector<8x8xf32>
    %57 = vector.extract_strided_slice %16 {offsets = [0, 16], sizes = [8, 8], strides = [1, 1]} : vector<8x32xf32> to vector<8x8xf32>
    %58 = vector.extract_strided_slice %21 {offsets = [0, 16], sizes = [8, 8], strides = [1, 1]} : vector<8x32xf32> to vector<8x8xf32>
    %59 = vector.extract_strided_slice %26 {offsets = [0, 16], sizes = [8, 8], strides = [1, 1]} : vector<8x32xf32> to vector<8x8xf32>
    %cst_26 = arith.constant dense<0.000000e+00> : vector<8x8xf32>
    %60 = tpu.matmul %57, %58, %cst_26 {dimension_numbers = #tpu.dot_dimension_numbers<[1], [1], [0], [0], [0, 0, 1, 0], [], []>} : vector<8x8xf32>, vector<8x8xf32>, vector<8x8xf32> -> vector<8x8xf32>
    %cst_27 = arith.constant dense<0xFF800000> : vector<8xf32>
    %61 = vector.multi_reduction <maximumf>, %60, %cst_27 [1] : vector<8x8xf32> to vector<8xf32>
    %62 = vector.shape_cast %61 : vector<8xf32> to vector<8x1xf32>
    %63 = vector.broadcast %62 : vector<8x1xf32> to vector<8x8xf32>
    %64 = arith.subf %60, %63 : vector<8x8xf32>
    %65 = math.exp %64 : vector<8x8xf32>
    %cst_28 = arith.constant dense<0.000000e+00> : vector<8xf32>
    %66 = vector.multi_reduction <add>, %65, %cst_28 [1] : vector<8x8xf32> to vector<8xf32>
    %67 = vector.shape_cast %66 : vector<8xf32> to vector<8x1xf32>
    %cst_29 = arith.constant dense<0.000000e+00> : vector<8x8xf32>
    %68 = tpu.matmul %65, %59, %cst_29 {dimension_numbers = #tpu.dot_dimension_numbers<[1], [0], [0], [1], [0, 0, 1, 1], [], []>} : vector<8x8xf32>, vector<8x8xf32>, vector<8x8xf32> -> vector<8x8xf32>
    %69 = tpu.reciprocal %67 : vector<8x1xf32> -> vector<8x1xf32>
    %70 = vector.broadcast %69 : vector<8x1xf32> to vector<8x8xf32>
    %71 = arith.mulf %68, %70 : vector<8x8xf32>
    %72 = vector.extract_strided_slice %16 {offsets = [0, 24], sizes = [8, 8], strides = [1, 1]} : vector<8x32xf32> to vector<8x8xf32>
    %73 = vector.extract_strided_slice %21 {offsets = [0, 24], sizes = [8, 8], strides = [1, 1]} : vector<8x32xf32> to vector<8x8xf32>
    %74 = vector.extract_strided_slice %26 {offsets = [0, 24], sizes = [8, 8], strides = [1, 1]} : vector<8x32xf32> to vector<8x8xf32>
    %cst_30 = arith.constant dense<0.000000e+00> : vector<8x8xf32>
    %75 = tpu.matmul %72, %73, %cst_30 {dimension_numbers = #tpu.dot_dimension_numbers<[1], [1], [0], [0], [0, 0, 1, 0], [], []>} : vector<8x8xf32>, vector<8x8xf32>, vector<8x8xf32> -> vector<8x8xf32>
    %cst_31 = arith.constant dense<0xFF800000> : vector<8xf32>
    %76 = vector.multi_reduction <maximumf>, %75, %cst_31 [1] : vector<8x8xf32> to vector<8xf32>
    %77 = vector.shape_cast %76 : vector<8xf32> to vector<8x1xf32>
    %78 = vector.broadcast %77 : vector<8x1xf32> to vector<8x8xf32>
    %79 = arith.subf %75, %78 : vector<8x8xf32>
    %80 = math.exp %79 : vector<8x8xf32>
    %cst_32 = arith.constant dense<0.000000e+00> : vector<8xf32>
    %81 = vector.multi_reduction <add>, %80, %cst_32 [1] : vector<8x8xf32> to vector<8xf32>
    %82 = vector.shape_cast %81 : vector<8xf32> to vector<8x1xf32>
    %cst_33 = arith.constant dense<0.000000e+00> : vector<8x8xf32>
    %83 = tpu.matmul %80, %74, %cst_33 {dimension_numbers = #tpu.dot_dimension_numbers<[1], [0], [0], [1], [0, 0, 1, 1], [], []>} : vector<8x8xf32>, vector<8x8xf32>, vector<8x8xf32> -> vector<8x8xf32>
    %84 = tpu.reciprocal %82 : vector<8x1xf32> -> vector<8x1xf32>
    %85 = vector.broadcast %84 : vector<8x1xf32> to vector<8x8xf32>
    %86 = arith.mulf %83, %85 : vector<8x8xf32>
    %87 = tpu.concatenate %41, %56, %71, %86 in 1 : vector<8x8xf32>, vector<8x8xf32>, vector<8x8xf32>, vector<8x8xf32> -> vector<8x32xf32>
    %c0_34 = arith.constant 0 : index
    %c0_35 = arith.constant 0 : index
    %c0_36 = arith.constant 0 : index
    %88 = vector.load %arg8[%c0_34, %c0_35, %c0_36] : memref<1x32x32xf32, #tpu.memory_space<vmem>>, vector<1x32x32xf32>
    %89 = vector.shape_cast %88 : vector<1x32x32xf32> to vector<32x32xf32>
    %cst_37 = arith.constant dense<0.000000e+00> : vector<8x32xf32>
    %90 = tpu.matmul %87, %89, %cst_37 {dimension_numbers = #tpu.dot_dimension_numbers<[1], [0], [0], [1], [0, 0, 1, 1], [], []>} : vector<8x32xf32>, vector<32x32xf32>, vector<8x32xf32> -> vector<8x32xf32>
    %c0_i32 = arith.constant 0 : i32
    %91 = arith.cmpi eq, %arg2, %c0_i32 : i32
    %92 = arith.extui %91 : i1 to i32
    %c0_i32_38 = arith.constant 0 : i32
    %93 = arith.cmpi ne, %92, %c0_i32_38 : i32
    scf.if %93 {
      %cst_45 = arith.constant 0.000000e+00 : f32
      %100 = vector.broadcast %cst_45 : f32 to vector<8x32xf32>
      %c0_46 = arith.constant 0 : index
      %c0_47 = arith.constant 0 : index
      %101 = vector.load %arg11[%c0_46, %c0_47] : memref<8x32xf32, #tpu.memory_space<vmem>>, vector<8x32xf32>
      tpu.vector_store %arg11[%c0_46, %c0_47], %100 {strides = array<i32>} : memref<8x32xf32, #tpu.memory_space<vmem>>, vector<8x32xf32>,
    } else {
    }
    %c0_39 = arith.constant 0 : index
    %c0_40 = arith.constant 0 : index
    %94 = vector.load %arg11[%c0_39, %c0_40] : memref<8x32xf32, #tpu.memory_space<vmem>>, vector<8x32xf32>
    %95 = arith.addf %94, %90 : vector<8x32xf32>
    %c0_41 = arith.constant 0 : index
    %c0_42 = arith.constant 0 : index
    %96 = vector.load %arg11[%c0_41, %c0_42] : memref<8x32xf32, #tpu.memory_space<vmem>>, vector<8x32xf32>
    tpu.vector_store %arg11[%c0_41, %c0_42], %95 {strides = array<i32>} : memref<8x32xf32, #tpu.memory_space<vmem>>, vector<8x32xf32>,
    %c0_i32_43 = arith.constant 0 : i32
    %97 = arith.cmpi eq, %arg2, %c0_i32_43 : i32
    %98 = arith.extui %97 : i1 to i32
    %c0_i32_44 = arith.constant 0 : i32
    %99 = arith.cmpi ne, %98, %c0_i32_44 : i32
    scf.if %99 {
      %c0_45 = arith.constant 0 : index
      %c0_46 = arith.constant 0 : index
      %100 = vector.load %arg11[%c0_45, %c0_46] : memref<8x32xf32, #tpu.memory_space<vmem>>, vector<8x32xf32>
      %c0_47 = arith.constant 0 : index
      %c0_48 = arith.constant 0 : index
      %101 = vector.load %arg9[%c0_47, %c0_48] : memref<1x32xf32, #tpu.memory_space<vmem>>, vector<1x32xf32>
      %102 = vector.broadcast %101 : vector<1x32xf32> to vector<8x32xf32>
      %103 = arith.addf %100, %102 : vector<8x32xf32>
      %c0_49 = arith.constant 0 : index
      %c0_50 = arith.constant 0 : index
      %c0_51 = arith.constant 0 : index
      %104 = vector.load %arg10[%c0_49, %c0_50, %c0_51] : memref<1x8x32xf32, #tpu.memory_space<vmem>>, vector<1x8x32xf32>
      %105 = vector.shape_cast %104 : vector<1x8x32xf32> to vector<8x32xf32>
      %106 = vector.shape_cast %103 : vector<8x32xf32> to vector<1x8x32xf32>
      tpu.vector_store %arg10[%c0_49, %c0_50, %c0_51], %106 {strides = array<i32>} : memref<1x8x32xf32, #tpu.memory_space<vmem>>, vector<1x8x32xf32>,
    } else {
    }
    return
  }
  func.func @transform_0(%arg0: i32, %arg1: i32, %arg2: i32) -> (i32, i32, i32) {
    %c0_i32 = arith.constant 0 : i32
    %c0_i32_0 = arith.constant 0 : i32
    %c0_i32_1 = arith.constant 0 : i32
    return %arg0, %c0_i32, %c0_i32_0 : i32, i32, i32
  }
  func.func @transform_1(%arg0: i32, %arg1: i32, %arg2: i32) -> (i32, i32, i32) {
    %c0_i32 = arith.constant 0 : i32
    %c0_i32_0 = arith.constant 0 : i32
    %c0_i32_1 = arith.constant 0 : i32
    return %arg2, %c0_i32, %c0_i32_0 : i32, i32, i32
  }
  func.func @transform_2(%arg0: i32, %arg1: i32, %arg2: i32) -> (i32, i32, i32) {
    %c0_i32 = arith.constant 0 : i32
    %c0_i32_0 = arith.constant 0 : i32
    %c0_i32_1 = arith.constant 0 : i32
    return %arg2, %c0_i32, %c0_i32_0 : i32, i32, i32
  }
  func.func @transform_3(%arg0: i32, %arg1: i32, %arg2: i32) -> (i32, i32, i32) {
    %c0_i32 = arith.constant 0 : i32
    %c0_i32_0 = arith.constant 0 : i32
    %c0_i32_1 = arith.constant 0 : i32
    return %arg2, %c0_i32, %c0_i32_0 : i32, i32, i32
  }
  func.func @transform_4(%arg0: i32, %arg1: i32, %arg2: i32) -> (i32, i32, i32) {
    %c0_i32 = arith.constant 0 : i32
    %c0_i32_0 = arith.constant 0 : i32
    %c0_i32_1 = arith.constant 0 : i32
    return %arg2, %c0_i32, %c0_i32_0 : i32, i32, i32
  }
  func.func @transform_5(%arg0: i32, %arg1: i32, %arg2: i32) -> (i32, i32, i32) {
    %c0_i32 = arith.constant 0 : i32
    %c0_i32_0 = arith.constant 0 : i32
    %c0_i32_1 = arith.constant 0 : i32
    return %arg2, %c0_i32, %c0_i32_0 : i32, i32, i32
  }
  func.func @transform_6(%arg0: i32, %arg1: i32, %arg2: i32) -> (i32, i32) {
    %c0_i32 = arith.constant 0 : i32
    %c0_i32_0 = arith.constant 0 : i32
    %c0_i32_1 = arith.constant 0 : i32
    return %c0_i32, %c0_i32_0 : i32, i32
  }
  func.func @transform_7(%arg0: i32, %arg1: i32, %arg2: i32) -> (i32, i32, i32) {
    %c0_i32 = arith.constant 0 : i32
    %c0_i32_0 = arith.constant 0 : i32
    return %arg0, %arg1, %c0_i32 : i32, i32, i32
  }
}

</mosaic_0001>

<bundles_post_ra>
// kernel: tpu_custom_call.1
= control target key start
LH: loop header
LB: loop body
LE: loop exit
PB: predicated region body
PF: predicated region fallthrough
CT: control target
= control target key end

     0   :  { %s2475_s0 = inlined_call_operand.hbm [shape: f32[2,8,32], index: 0, kind: input, shape index: {}]   ;;  %s2476_s1 = inlined_call_operand.hbm [shape: f32[1,32,32], index: 1, kind: input, shape index: {}]   ;;  %s2477_s2 = inlined_call_operand.hbm [shape: f32[1,32,32], index: 2, kind: input, shape index: {}]   ;;  %s2478_s3 = inlined_call_operand.hbm [shape: f32[1,32,32], index: 3, kind: input, shape index: {}]   ;;  %s2479_s4 = inlined_call_operand.vmem [shape: f32[1,1,96], index: 4, kind: input, shape index: {}]   ;;  %s2480_s5 = inlined_call_operand.hbm [shape: f32[1,32,32], index: 5, kind: input, shape index: {}]   ;;  %s2481_s6 = inlined_call_operand.vmem [shape: f32[1,32], index: 6, kind: input, shape index: {}]   ;;  %s2482_s7 = inlined_call_operand.hbm [shape: f32[2,8,32], index: 7, kind: output, shape index: {}]  }
   0x1   :  { %2483 = sst [smem:[#allocation17_spill]] %s2476_s1 }
   0x2   :  { %2484 = sst [smem:[#allocation18_spill]] %s2477_s2 }
   0x3   :  { %2485 = sst [smem:[#allocation19_spill]] %s2478_s3 }
   0x4   :  { %2486 = sst [smem:[#allocation20_spill]] %s2480_s5 }
   0x5   :  { %12 = vsyncpa [#allocation4], 0 }
   0x6   :  { %14 = vsyncpa [#allocation4 + $0x1], 0 }
   0x7   :  { %15 = vsyncpa [#allocation7], 0 }
   0x8   :  { %16 = vsyncpa [#allocation10], 0 }
   0x9   :  { %17 = vsyncpa [#allocation5], 0 }
   0xa   :  { %19 = vsyncpa [#allocation5 + $0x1], 0  ;;  %s2165_s24 = smov 0   ;;  %s2167_s25 = smov 0  }
   0xb   :  { %s2169_s26 = smov 0   ;;  %s2171_s27 = smov 0  }
   0xc   :  { %s2173_s28 = smov 0   ;;  %s2175_s29 = smov 0  }
   0xd LB: > { %s1594_s30 = sadd.s32 4294967295, %s2105_s29   ;;  %p1596_p0 = scmp.ge.s32.totalorder %s2105_s29, 1  ;;  %s2105_s29 = sphi %s2175_s29, %s25_s29   ;;  %s2101_s28 = sphi %s2173_s28, %s2505_s28   ;;  %s2097_s27 = sphi %s2171_s27, %s2504_s27   ;;  %s2093_s26 = sphi %s2169_s26, %s2503_s26   ;;  %s2089_s25 = sphi %s2167_s25, %s2502_s25   ;;  %s2085_s24 = sphi %s2165_s24, %s2501_s24  }
   0xe   : > { %p2199_p1 = scmp.eq.s32.totalorder %s1594_s30, 0  ;;  %p254_p2 = scmp.lt.s32.totalorder %s2105_s29, 3 }
   0xf   : > { %s2107_s10 = smov [#allocation6]   ;;  %s2108_s13 = smov [#allocation9]  }
  0x10   : > { %p2204_p3 = pnand %p1596_p0, %p254_p2  ;;  %s269_s11 = sshll.u32 %s2107_s10, 4  ;;  %s270_s11 = int_to_ptr.vmem [resolvable:$true] %s269_s11 }
  0x11   : > { %s301_s14 = sshll.u32 %s2108_s13, 4  ;;  %s2109_s15 = smov [#allocation8]   ;;  %s302_s14 = int_to_ptr.vmem [resolvable:$true] %s301_s14 }
  0x12   : > { %p1774_p4 = pneg %p2204_p3  ;;  %s285_s16 = sshll.u32 %s2109_s15, 4  ;;  %s286_s16 = int_to_ptr.vmem [resolvable:$true] %s285_s16 }
  0x13   : > { %s1896_s17 = scalar_lea.vmem %s270_s11, 512  ;;  %p1904_p11 = scmp.lt.s32.totalorder %s270_s11, %s270_s11 }
  0x14   : > { %p2213_p6 = pnand %p1774_p4, %p2199_p1  ;;  %p1897_p8 = scmp.ne.s32.totalorder %s270_s11, %s1896_s17 }
  0x15   : > { %p1905_p12 = scmp.lt.s32.totalorder %s1896_s17, %s1896_s17 }
  0x16   : > { %p1887_p7 = pneg %p2213_p6 }
  0x17   : > { %p1906_p13 = por %p1905_p12, %p1904_p11 }
  0x18   : > { %p1899_p9 = pnand %p1897_p8, %p1887_p7 }
  0x1a   : > { %p1900_p10 = pneg %p1899_p9 }
  0x1c   : > { %p1907_p0 = pnand %p1906_p13, %p1900_p10 }
  0x1e   : > { %1910 = shalt.err (!%p1907_p0)
}
  0x1f   : > { %s2110_s18 = smov 128   ;;  %s2111_s19 = smov 8  }
  0x20   : > { %s2490_s1 = sld [smem:[#allocation17_spill]]  ;;  %s1922_s22 = scalar_lea.vmem %s302_s14, 512 }
  0x21   : > { %p1923_p2 = scmp.ne.s32.totalorder %s302_s14, %s1922_s22  ;;  %p1930_p9 = scmp.lt.s32.totalorder %s302_s14, %s302_s14 }
  0x22   : > { %p1931_p10 = scmp.lt.s32.totalorder %s1922_s22, %s1922_s22 }
  0x23   : > { %p1925_p4 = pnand %p1923_p2, %p1887_p7 }
  0x24   : > { %p1932_p11 = por %p1931_p10, %p1930_p9 }
  0x25   : > { %p1926_p8 = pneg %p1925_p4 }
  0x26   : > { %1777 = dma.hbm_to_vmem [thread:$0]  (!%p2213_p6), %s2490_s1, 512, %s270_s11, [#allocation7], %s2110_s18, %s2110_s18, %s2111_s19  }
  0x27   : > { %p1933_p12 = pnand %p1932_p11, %p1926_p8 }
  0x29   : > { %1936 = shalt.err (!%p1933_p12)
}
  0x2a   : > { %s2491_s3 = sld [smem:[#allocation19_spill]]  ;;  %s1948_s11 = scalar_lea.vmem %s286_s16, 512 }
  0x2b   : > { %p1949_p13 = scmp.ne.s32.totalorder %s286_s16, %s1948_s11  ;;  %p1956_p4 = scmp.lt.s32.totalorder %s286_s16, %s286_s16 }
  0x2c   : > { %p1957_p8 = scmp.lt.s32.totalorder %s1948_s11, %s1948_s11 }
  0x2d   : > { %p1951_p0 = pnand %p1949_p13, %p1887_p7 }
  0x2e   : > { %p1958_p9 = por %p1957_p8, %p1956_p4 }
  0x2f   : > { %p1952_p2 = pneg %p1951_p0 }
  0x30   : > { %1783 = dma.hbm_to_vmem [thread:$0]  (!%p2213_p6), %s2491_s3, 512, %s302_s14, [#allocation10], %s2110_s18, %s2110_s18, %s2111_s19  }
  0x31   : > { %p1959_p10 = pnand %p1958_p9, %p1952_p2 }
  0x33   : > { %1962 = shalt.err (!%p1959_p10)
}
  0x34   : > { %s2492_s2 = sld [smem:[#allocation18_spill]]  ;;  %s2112_s14 = smov [#allocation11]  }
  0x35   : > { %s323_s17 = sshll.u32 %s2112_s14, 4  ;;  %s324_s17 = int_to_ptr.vmem [resolvable:$true] %s323_s17 }
  0x36   : > { %s1974_s20 = scalar_lea.vmem %s324_s17, 512  ;;  %p1982_p0 = scmp.lt.s32.totalorder %s324_s17, %s324_s17 }
  0x37   : > { %p1975_p11 = scmp.ne.s32.totalorder %s324_s17, %s1974_s20  ;;  %p1983_p2 = scmp.lt.s32.totalorder %s1974_s20, %s1974_s20 }
  0x39   : > { %p1977_p12 = pnand %p1975_p11, %p1887_p7  ;;  %p1984_p4 = por %p1983_p2, %p1982_p0 }
  0x3a   : > { %1780 = dma.hbm_to_vmem [thread:$0]  (!%p2213_p6), %s2492_s2, 512, %s286_s16, [#allocation7], %s2110_s18, %s2110_s18, %s2111_s19  }
  0x3b   : > { %p1978_p13 = pneg %p1977_p12 }
  0x3d   : > { %p1985_p8 = pnand %p1984_p4, %p1978_p13 }
  0x3f   : > { %1988 = shalt.err (!%p1985_p8)
}
  0x40   : > { %s2493_s5 = sld [smem:[#allocation20_spill]]  ;;  %s1595_s12 = sadd.s32 4294967294, %s2105_s29  }
  0x41   : > { %s44_s22 = sadd.s32 1, %s2101_s28  ;;  %s51_s23 = sadd.s32 1, %s2093_s26 }
  0x42   : > { %p46_p7 = scmp.ge.s32.totalorder %s44_s22, 2  ;;  %p58_p9 = scmp.ne.s32.totalorder %s2093_s26, %s2089_s25 }
  0x43   : > { %p59_p10 = scmp.eq.s32.totalorder %s2105_s29, 0  ;;  %p64_p12 = scmp.ne.s32.totalorder %s2089_s25, %s2085_s24 }
  0x44   : > { %s2507_s22 = smov (%p46_p7, %s44_s22), 0  ;;  %p247_p4 = scmp.eq.s32.totalorder %s1595_s12, 1 }
  0x45   : > { %p2271_p11 = por %p59_p10, %p58_p9  ;;  %p2283_p0 = por %p2199_p1, %p64_p12 }
  0x46   : > { %1786 = dma.hbm_to_vmem [thread:$0]  (!%p2213_p6), %s2493_s5, 512, %s324_s17, [#allocation10], %s2110_s18, %s2110_s18, %s2111_s19  }
  0x47   : > { %s48_s18 = ssub.s32 %s2101_s28, %s2507_s22  ;;  %p241_p6 = scmp.eq.s32.totalorder %s1594_s30, 1 }
  0x48   : > { %p49_p13 = scmp.eq.s32.totalorder %s48_s18, 0  ;;  %p2294_p8 = por %p247_p4, %p64_p12 }
  0x49   : > { %p2287_p2 = por %p241_p6, %p58_p9  ;;  %p1799_p7 = scmp.lt.s32.totalorder %s2105_s29, 2 }
  0x4a   : > { %s2292_s13 = scalar_select %p49_p13, %s2093_s26, %s51_s23  }
  0x4b   : > { %s2497_s15 = scalar_select %p2294_p8, 1, 0 }
  0x4c   : > { %s340_s14 = sand.u32 1, %s2093_s26   ;;  %s1604_s30 = sshll.u32 %s2101_s28, 7 }
  0x4d   : > { %s1603_s17 = sshll.u32 %s340_s14, 3  ;;  %s349_s21 = scalar_lea.hbm %s2475_s0, %s1604_s30 }
  0x4e   : > { %s344_s18 = scalar_lea.vmem [#allocation3], %s1603_s17  ;;  %p2306_p9 = pnand %p1799_p7, %p2271_p11 }
  0x4f   : > { %s351_s1 = sshll.u32 %s344_s18, 4  ;;  %s341_s12 = scalar_lea.sflag [#allocation4], %s340_s14  ;;  %s352_s1 = int_to_ptr.vmem [resolvable:$true] %s351_s1 }
  0x50   : > { %p1991_p10 = pneg %p2306_p9  ;;  %s2002_s23 = scalar_lea.vmem %s352_s1, 128 }
  0x51   : > { %p2003_p12 = scmp.ne.s32.totalorder %s352_s1, %s2002_s23  ;;  %s2113_s3 = smov [#allocation3]  }
  0x52   : > { %s2007_s5 = sshll.u32 %s2113_s3, 4  ;;  %s2008_s5 = int_to_ptr.vmem [resolvable:$false] %s2007_s5 }
  0x53   : > { %p2005_p6 = pnand %p2003_p12, %p1991_p10  ;;  %s2009_s30 = scalar_lea.vmem %s2008_s5, 256 }
  0x54   : > { %p2010_p4 = scmp.lt.s32.totalorder %s352_s1, %s2008_s5  ;;  %p2011_p5 = scmp.lt.s32.totalorder %s2009_s30, %s2002_s23 }
  0x55   : > { %p2006_p13 = pneg %p2005_p6 }
  0x56   : > { %p2012_p8 = por %p2011_p5, %p2010_p4 }
  0x58   : > { %p2013_p11 = pnand %p2012_p8, %p2006_p13 }
  0x5a   : > { %2016 = shalt.err (!%p2013_p11)
}
  0x5b   : > { %1790 = dma.hbm_to_vmem [thread:$0]  (!%p2306_p9), %s349_s21, 128, %s352_s1, %s341_s12  }
  0x5c   : > { %360 = sbr.rel (%p2204_p3) target bundleno = 1551 (0x60f), region = 48  ;;  %s2317_s10 = sand.u32 (!%p2204_p3), 1, %s2089_s25  }
  0x5d   : > { %s1606_s3 = sshll.u32 (!%p2204_p3), %s2317_s10, 3  ;;  %s363_s14 = scalar_lea.sflag (!%p2204_p3), [#allocation4], %s2317_s10 }
  0x5e   : > { %s2323_s5 = scalar_lea.vmem (!%p2204_p3), [#allocation3], %s1606_s3 }
  0x61   : > { %2068 = dma.done.wait (%p2283_p0), %s363_s14, 128  }
  0x62   : > { %2070 = vsyncadd (%p2283_p0), %s363_s14, 4294967168 }
  0x63   : > { %2072 = dma.done.wait (%p2199_p1), [#allocation7], 1024  }
  0x64   : > { %2074 = vsyncadd (%p2199_p1), [#allocation7], 4294966272 }
  0x65   : > { %2076 = dma.done.wait (%p2199_p1), [#allocation10], 1024  }
  0x66   : > { %2078 = vsyncadd (%p2199_p1), [#allocation10], 4294966272  ;;  %vm434_vm0 = vcmask 261120   ;;  %v2114_v0 = vmov 0.0   ;;  %vm2115_vm1 = vmmov 0   ;;  %v511_v1 = vld [vmem:[#allocation8 + $0x18] sm:$0xff] }
  0x67   : > { %1681 = vmatprep.subr.mxu1 %v2114_v0  ;;  %1670 = vmatprep.subr.mxu0 %v2114_v0  ;;  %1420 = vst.msk [vmem:[#allocation2] sm:$0xff] %vm434_vm0, %v2114_v0  ;;  %v427_v2 = vld [vmem:[#allocation6 + $0x18] sm:$0xff]  ;;  %v510_v3 = vld [vmem:[#allocation8 + $0x10] sm:$0xff]  ;;  %v509_v5 = vld [vmem:[#allocation8 + $0x8] sm:$0xff]  ;;  %s2116_s8 = smov 96   ;;  %s2117_s9 = smov 64  }
  0x68   : > { %1689 = vmatprep.mubr.msk.f32.mxu1 %vm2115_vm1, %v2114_v0  ;;  %1678 = vmatprep.mubr.msk.f32.mxu0 %vm2115_vm1, %v2114_v0  ;;  %v426_v4 = vld [vmem:[#allocation6 + $0x10] sm:$0xff]  ;;  %v425_v6 = vld [vmem:[#allocation6 + $0x8] sm:$0xff]  ;;  %v508_v7 = vld [vmem:[#allocation8] sm:$0xff]  ;;  %vm665_vm2 = vcmask 64512   ;;  %s2118_s19 = smov 120   ;;  %s2119_s17 = smov 112  }
  0x69   : > { %1682 = vmatpush3.msra.mxu1 %v511_v1  ;;  %1671 = vmatpush3.msra.mxu0 %v427_v2  ;;  %v424_v8 = vld [vmem:[#allocation6] sm:$0xff]  ;;  %v419_v9 = vld [vmem:[%s2323_s5] sm:$0xff]  ;;  %v1612_v10 = vld [vmem:[%s2479_s4] ss:$0 sm:$0xff]  ;;  %s2120_s20 = smov 104   ;;  %s2121_s16 = smov 8  }
  0x6a   : > { %1683 = vmatprep.subr.mxu1 %v2114_v0  ;;  %1672 = vmatprep.subr.mxu0 %v2114_v0  ;;  %v591_v11 = vld [vmem:[#allocation9 + $0x18] sm:$0xff]  ;;  %v590_v12 = vld [vmem:[#allocation9 + $0x10] sm:$0xff]  ;;  %v589_v13 = vld [vmem:[#allocation9 + $0x8] sm:$0xff]  ;;  %s2122_s21 = smov 16   ;;  %s2123_s18 = smov 24   ;;  %vm1335_vm3 = vcmask 130048  }
  0x6b   : > { %1684 = vmatpush3.msra.mxu1 %v510_v3  ;;  %1673 = vmatpush3.msra.mxu0 %v426_v4  ;;  %v588_v14 = vld [vmem:[#allocation9] sm:$0xff]  ;;  %vm1337_vm4 = vcmask 195584   ;;  %s1631_s30 = sshll.u32 %s2097_s27, 7  ;;  %s415_s14 = scalar_lea.vmem [#allocation12], %s1606_s3 }
  0x6c   : > { %1685 = vmatprep.subr.mxu1 %v2114_v0  ;;  %1674 = vmatprep.subr.mxu0 %v2114_v0  ;;  %s1452_s5 = sshll.u32 %s415_s14, 4  ;;  %s1453_s5 = int_to_ptr.vmem [resolvable:$true] %s1452_s5 }
  0x6d   : > { %1686 = vmatpush3.msra.mxu1 %v509_v5  ;;  %1675 = vmatpush3.msra.mxu0 %v425_v6 }
  0x6e   : > { %1687 = vmatprep.subr.mxu1 %v2114_v0  ;;  %1676 = vmatprep.subr.mxu0 %v2114_v0 }
  0x6f   : > { %1688 = vmatpush3.msra.mxu1 %v508_v7  ;;  %1677 = vmatpush3.msra.mxu0 %v424_v8  ;;  %v1342_v8 = vld [vmem:[#allocation11 + $0x18] sm:$0xff] }
  0x70   : > { %1690 = vmatmul.mubr.msk.f32.vlgmr.msra.gmra.mxu1 %vm434_vm0, %v419_v9  ;;  %1679 = vmatmul.mubr.msk.f32.vlgmr.msra.gmra.mxu0 %vm434_vm0, %v419_v9 }
  0x71   : > { %512 = vrot.lane.b32.xlu0 %v1612_v10, %s2116_s8  ;;  %592 = vrot.lane.b32.xlu1 %v1612_v10, %s2117_s9  ;;  %s1450_s8 = scalar_lea.hbm %s2482_s7, %s1631_s30  ;;  %s1438_s9 = scalar_lea.sflag [#allocation5], %s2317_s10 }
  0x72   : > { %1703 = vmatprep.subr.mxu1 %v2114_v0  ;;  %1705 = vmatprep.mubr.msk.f32.mxu1 %vm2115_vm1, %v2114_v0 }
  0x73   : > { %1692 = vmatprep.subr.mxu0 %v2114_v0  ;;  %1700 = vmatprep.mubr.msk.f32.mxu0 %vm2115_vm1, %v2114_v0 }
  0x74   : > { %1693 = vmatpush3.msra.mxu0 %v591_v11  ;;  %v1340_v11 = vld [vmem:[#allocation11 + $0x8] sm:$0xff] }
  0x75   : > { %1694 = vmatprep.subr.mxu0 %v2114_v0 }
  0x76   : > { %1695 = vmatpush3.msra.mxu0 %v590_v12  ;;  %v1339_v12 = vld [vmem:[#allocation11] sm:$0xff] }
  0x77   : > { %1696 = vmatprep.subr.mxu0 %v2114_v0 }
  0x78   : > { %1697 = vmatpush3.msra.mxu0 %v589_v13 }
  0x79   : > { %1698 = vmatprep.subr.mxu0 %v2114_v0 }
  0x7a   : > { %1699 = vmatpush3.msra.mxu0 %v588_v14 }
  0x7b   : > { %1701 = vmatmul.mubr.msk.f32.vlgmr.msra.gmra.mxu0 %vm434_vm0, %v419_v9  ;;  %1723 = vmatprep.subr.mxu0 %v2114_v0 }
  0x7c   : > { %1725 = vmatprep.mubr.msk.f32.mxu0 %vm2115_vm1, %v2114_v0 }
  0xe3   : > { %v513_v15 = vpop.permute.xlu0 %512  ;;  %v593_v22 = vpop.permute.xlu1 %592 }
 0x130   : > { %v584_v16 = vpop.f32.mrf.mxu1  ;;  %v504_v17 = vpop.f32.mrf.mxu0 }
 0x131   : > { %v585_v18 = vadd.f32 %v584_v16, %v513_v15  ;;  %v505_v19 = vadd.f32 %v1612_v10, %v504_v17  ;;  %v1341_v10 = vld [vmem:[#allocation11 + $0x10] sm:$0xff] }
 0x132   : > { %v1691_v20 = vpop.f32.mrf.mxu1  ;;  %v1680_v21 = vpop.f32.mrf.mxu0 }
 0x133   : > { %828 = vrot.lane.b32.xlu1 %v585_v18, %s2118_s19  ;;  %1704 = vmatpush3.xpose.msk.msra.mxu1 %vm665_vm2, %v585_v18 }
 0x134   : > { %1708 = vmatprep.subr.mxu1 %v2114_v0 }
 0x136   : > { %1706 = vmatmul.mubr.msk.f32.vlgmr.msra.gmra.mxu1 %vm665_vm2, %v505_v19 }
 0x137   : > { %826 = vrot.lane.b32.xlu1 %v505_v19, %s2118_s19  ;;  %1710 = vmatprep.mubr.msk.f32.mxu1 %vm2115_vm1, %v2114_v0 }
 0x13b   : > { %994 = vrot.lane.b32.xlu1 %v585_v18, %s2119_s17  ;;  %v661_v23 = vpop.f32.mrf.mxu0 }
 0x13c   : > { %v662_v24 = vadd.f32 %v661_v23, %v593_v22 }
 0x13d   : > { %v1702_v25 = vpop.f32.mrf.mxu0 }
 0x13e   : > { %1709 = vmatpush3.msra.mxu1 %v662_v24 }
 0x13f   : > { %992 = vrot.lane.b32.xlu1 %v505_v19, %s2119_s17  ;;  %1713 = vmatprep.subr.mxu1 %v2114_v0 }
 0x143   : > { %1159 = vrot.lane.b32.xlu1 %v585_v18, %s2120_s20 }
 0x147   : > { %1157 = vrot.lane.b32.xlu1 %v505_v19, %s2120_s20 }
 0x1a5   : > { %v829_v26 = vpop.permute.xlu1 %828 }
 0x1a9   : > { %v827_v27 = vpop.permute.xlu1 %826 }
 0x1ad   : > { %v995_v28 = vpop.permute.xlu1 %994 }
 0x1ae   : > { %1724 = vmatpush3.xpose.msk.msra.mxu0 %vm665_vm2, %v995_v28 }
 0x1af   : > { %1733 = vmatprep.subr.mxu0 %v2114_v0 }
 0x1b1   : > { %v993_v29 = vpop.permute.xlu1 %992 }
 0x1b2   : > { %1726 = vmatmul.mubr.msk.f32.vlgmr.msra.gmra.mxu0 %vm665_vm2, %v993_v29 }
 0x1b3   : > { %1735 = vmatprep.mubr.msk.f32.mxu0 %vm2115_vm1, %v2114_v0 }
 0x1b5   : > { %v1160_v30 = vpop.permute.xlu1 %1159 }
 0x1b6   : > { %1734 = vmatpush3.xpose.msk.msra.mxu0 %vm665_vm2, %v1160_v30 }
 0x1b7   : > { %1743 = vmatprep.subr.mxu0 %v2114_v0 }
 0x1b9   : > { %v1158_v31 = vpop.permute.xlu1 %1157 }
 0x1ba   : > { %1736 = vmatmul.mubr.msk.f32.vlgmr.msra.gmra.mxu0 %vm665_vm2, %v1158_v31 }
 0x1bb   : > { %1751 = vmatprep.mubr.msk.f32.mxu0 %vm2115_vm1, %v2114_v0  ;;  %1744 = vmatpush3.msra.mxu0 %v1342_v8 }
 0x1bc   : > { %1745 = vmatprep.subr.mxu0 %v2114_v0 }
 0x1bd   : > { %1746 = vmatpush3.msra.mxu0 %v1341_v10 }
 0x1be   : > { %1747 = vmatprep.subr.mxu0 %v2114_v0 }
 0x1bf   : > { %1748 = vmatpush3.msra.mxu0 %v1340_v11 }
 0x1c0   : > { %1749 = vmatprep.subr.mxu0 %v2114_v0 }
 0x1c1   : > { %1750 = vmatpush3.msra.mxu0 %v1339_v12 }
 0x1f6   : > { %v738_v32 = vpop.f32.mrf.mxu1 }
 0x1f7   : > { %v742_v33 = vsel %vm665_vm2, %v738_v32, -inf }
 0x1f8   : > { %743 = vmax.xlane.f32.xlu0 %v742_v33  ;;  %v1707_v34 = vpop.f32.mrf.mxu1  ;;  %v1421_v33 = vld [vmem:[#allocation2] sm:$0xff] }
 0x20e   : > { %914 = vrot.lane.b32.xlu0 %v662_v24, %s2118_s19  ;;  %s2017_s19 = scalar_lea.vmem %s1453_s5, 128 }
 0x20f   : > { %p2018_p1 = scmp.ne.s32.totalorder %s1453_s5, %s2017_s19 }
 0x211   : > { %p2019_p3 = pnand %p2018_p1, %p2287_p2 }
 0x213   : > { %p2020_p5 = pneg %p2019_p3 }
 0x272   : > { %v1066_v35 = vpop.f32.mrf.mxu0 }
 0x273   : > { %v1070_v36 = vsel %vm665_vm2, %v1066_v35, -inf }
 0x274   : > { %v1727_v37 = vpop.f32.mrf.mxu0  ;;  %1071 = vmax.xlane.f32.xlu0 %v1070_v36 }
 0x275   : > { %v1629_v37 = vld [vmem:[%s2481_s6] ss:$0 sm:$0xff] }
 0x27a   : > { %v1231_v38 = vpop.f32.mrf.mxu0 }
 0x27b   : > { %v1235_v39 = vsel %vm665_vm2, %v1231_v38, -inf }
 0x27c   : > { %v1737_v40 = vpop.f32.mrf.mxu0  ;;  %1236 = vmax.xlane.f32.xlu0 %v1235_v39 }
 0x281   : > { %v744_v41 = vpop.xlane.xlu0 %743 }
 0x282   : > { %v745_v42 = vsub.f32 %v738_v32, %v744_v41 }
 0x284   : > { %v746_v43 = vmul.f32 1.442695, %v745_v42 }
 0x285   : > { %v915_v45 = vpop.permute.xlu0 %914 }
 0x286   : > { %1869 = vpow2.f32 %v746_v43 }
 0x292   : > { %1244 = vrot.lane.b32.xlu0 %v662_v24, %s2120_s20 }
 0x293   : > { %v1870_v44 = vpop.eup %1869 }
 0x294   : > { %1711 = vmatmul.mubr.msk.f32.vlgmr.msra.gmra.mxu1 %vm665_vm2, %v1870_v44  ;;  %v748_v5 = vsel %vm665_vm2, %v1870_v44, 0.0 }
 0x295   : > { %1714 = vmatpush3.xpose.msk.msra.mxu1 %vm665_vm2, %v829_v26  ;;  %1715 = vmatprep.mubr.msk.f32.mxu1 %vm2115_vm1, %v2114_v0 }
 0x296   : > { %1718 = vmatprep.subr.mxu1 %v2114_v0 }
 0x298   : > { %1716 = vmatmul.mubr.msk.f32.vlgmr.msra.gmra.mxu1 %vm665_vm2, %v827_v27 }
 0x299   : > { %1719 = vmatpush3.msra.mxu1 %v915_v45  ;;  %1720 = vmatprep.mubr.msk.f32.mxu1 %vm2115_vm1, %v2114_v0 }
 0x29a   : > { %1728 = vmatprep.subr.mxu1 %v2114_v0 }
 0x2fd   : > { %v1072_v51 = vpop.xlane.xlu0 %1071 }
 0x2fe   : > { %v1073_v52 = vsub.f32 %v1066_v35, %v1072_v51 }
 0x300   : > { %v1074_v53 = vmul.f32 1.442695, %v1073_v52 }
 0x302   : > { %1871 = vpow2.f32 %v1074_v53 }
 0x305   : > { %v1237_v56 = vpop.xlane.xlu0 %1236 }
 0x306   : > { %v1238_v57 = vsub.f32 %v1231_v38, %v1237_v56 }
 0x308   : > { %v1239_v60 = vmul.f32 1.442695, %v1238_v57 }
 0x309   : > { %v1245_v3 = vpop.permute.xlu0 %1244 }
 0x30f   : > { %v1872_v54 = vpop.eup %1871 }
 0x310   : > { %v1076_v55 = vsel %vm665_vm2, %v1872_v54, 0.0 }
 0x354   : > { %v2406_v46 = vpop.f32.mrf.mxu1 }
 0x356   : > { %v1712_v47 = vpop.f32.mrf.mxu1 }
 0x358   : > { %v900_v48 = vpop.f32.mrf.mxu1 }
 0x359   : > { %v904_v49 = vsel %vm665_vm2, %v900_v48, -inf }
 0x35a   : > { %905 = vmax.xlane.f32.xlu1 %v904_v49  ;;  %v1717_v50 = vpop.f32.mrf.mxu1 }
 0x36b   : > { %1079 = vrot.lane.b32.xlu1 %v662_v24, %s2119_s17  ;;  %s2124_s17 = smov [#allocation12]  }
 0x36c   : > { %s2021_s27 = sshll.u32 %s2124_s17, 4  ;;  %s2022_s27 = int_to_ptr.vmem [resolvable:$false] %s2021_s27 }
 0x36d   : > { %s2023_s3 = scalar_lea.vmem %s2022_s27, 256  ;;  %p2024_p0 = scmp.lt.s32.totalorder %s1453_s5, %s2022_s27 }
 0x36e   : > { %p2025_p8 = scmp.lt.s32.totalorder %s2023_s3, %s2017_s19 }
 0x370   : > { %p2026_p7 = por %p2025_p8, %p2024_p0 }
 0x372   : > { %p2027_p9 = pnand %p2026_p7, %p2020_p5 }
 0x38f   : > { %1077 = vadd.xlane.f32.xlu1 %v1076_v55 }
 0x3e3   : > { %v906_v58 = vpop.xlane.xlu1 %905 }
 0x3e4   : > { %v907_v59 = vsub.f32 %v900_v48, %v906_v58 }
 0x3e6   : > { %v908_v61 = vmul.f32 1.442695, %v907_v59 }
 0x3e7   : > { %v1080_v63 = vpop.permute.xlu1 %1079 }
 0x3e8   : > { %1873 = vpow2.f32 %v908_v61 }
 0x3e9   : > { %1875 = vpow2.f32 %v1239_v60 }
 0x3f5   : > { %v1874_v62 = vpop.eup %1873 }
 0x3f6   : > { %1721 = vmatmul.mubr.msk.f32.vlgmr.msra.gmra.mxu1 %vm665_vm2, %v1874_v62  ;;  %v910_v1 = vsel %vm665_vm2, %v1874_v62, 0.0  ;;  %v1876_v2 = vpop.eup %1875 }
 0x3f7   : > { %1729 = vmatpush3.msra.mxu1 %v1080_v63  ;;  %911 = vadd.xlane.f32.xlu0 %v910_v1  ;;  %v1241_v4 = vsel %vm665_vm2, %v1876_v2, 0.0 }
 0x3f8   : > { %1730 = vmatprep.mubr.msk.f32.mxu1 %vm2115_vm1, %v2114_v0  ;;  %1738 = vmatprep.subr.mxu1 %v2114_v0 }
 0x3fa   : > { %1731 = vmatmul.mubr.msk.f32.vlgmr.msra.gmra.mxu1 %vm665_vm2, %v1872_v54 }
 0x3fb   : > { %1739 = vmatpush3.msra.mxu1 %v1245_v3  ;;  %1242 = vadd.xlane.f32.xlu0 %v1241_v4 }
 0x3fc   : > { %1740 = vmatprep.mubr.msk.f32.mxu1 %vm2115_vm1, %v2114_v0 }
 0x3fe   : > { %1741 = vmatmul.mubr.msk.f32.vlgmr.msra.gmra.mxu1 %vm665_vm2, %v1876_v2 }
 0x3ff   : > { %749 = vadd.xlane.f32.xlu0 %v748_v5 }
 0x418   : > { %v1078_v7 = vpop.xlane.xlu1 %1077 }
 0x480   : > { %v912_v6 = vpop.xlane.xlu0 %911 }
 0x481   : > { %1877 = vrcp.f32 %v912_v6 }
 0x482   : > { %1879 = vrcp.f32 %v1078_v7 }
 0x484   : > { %v1243_v9 = vpop.xlane.xlu0 %1242 }
 0x485   : > { %1881 = vrcp.f32 %v1243_v9 }
 0x488   : > { %v750_v0 = vpop.xlane.xlu0 %749 }
 0x489   : > { %1883 = vrcp.f32 %v750_v0 }
 0x48e   : > { %v1878_v13 = vpop.eup %1877 }
 0x48f   : > { %v1880_v17 = vpop.eup %1879 }
 0x492   : > { %v1882_v21 = vpop.eup %1881 }
 0x496   : > { %v1884_v25 = vpop.eup %1883 }
 0x497   : > { %v825_v27 = vmul.f32 %v1884_v25, %v2406_v46 }
 0x4b6   : > { %v986_v14 = vpop.f32.mrf.mxu1 }
 0x4b7   : > { %v991_v15 = vmul.f32 %v1878_v13, %v986_v14 }
 0x4b8   : > { %v1722_v16 = vpop.f32.mrf.mxu1 }
 0x4b9   : > { %1323 = vrot.lane.b32.xlu0 %v991_v15, %s2121_s16 }
 0x4ba   : > { %v1151_v18 = vpop.f32.mrf.mxu1 }
 0x4bb   : > { %v1156_v19 = vmul.f32 %v1880_v17, %v1151_v18 }
 0x4bc   : > { %v1732_v20 = vpop.f32.mrf.mxu1 }
 0x4bd   : > { %1327 = vrot.lane.b32.xlu1 %v1156_v19, %s2122_s21 }
 0x4be   : > { %v1316_v22 = vpop.f32.mrf.mxu1 }
 0x4bf   : > { %v1321_v23 = vmul.f32 %v1882_v21, %v1316_v22 }
 0x4c0   : > { %v1742_v24 = vpop.f32.mrf.mxu1 }
 0x4c1   : > { %1331 = vrot.lane.b32.xlu0 %v1321_v23, %s2123_s18 }
 0x52b   : > { %v1324_v26 = vpop.permute.xlu0 %1323 }
 0x52c   : > { %v1334_v29 = vsel %vm665_vm2, %v825_v27, %v1324_v26 }
 0x52f   : > { %v1328_v28 = vpop.permute.xlu1 %1327 }
 0x530   : > { %v1336_v30 = vsel %vm1335_vm3, %v1334_v29, %v1328_v28 }
 0x533   : > { %v1332_v31 = vpop.permute.xlu0 %1331 }
 0x534   : > { %v1338_v32 = vsel %vm1337_vm4, %v1336_v30, %v1332_v31 }
 0x535   : > { %1752 = vmatmul.mubr.msk.f32.vlgmr.msra.gmra.mxu0 %vm434_vm0, %v1338_v32 }
 0x5f5   : > { %v1412_v34 = vpop.f32.mrf.mxu0 }
 0x5f6   : > { %v1422_v35 = vadd.f32 %v1421_v33, %v1412_v34 }
 0x5f7   : > { %v1753_v36 = vpop.f32.mrf.mxu0 }
 0x5f8   : > { %1423 = vst.msk [vmem:[#allocation2] sm:$0xff] %vm434_vm0, %v1422_v35 }
 0x5ff   : > { %v1427_v38 = vld [vmem:[#allocation2] sm:$0xff] }
 0x600   : > { %v1435_v39 = vadd.f32 %v1629_v37, %v1427_v38 }
 0x602   : > { %1436 = vst.msk [vmem:[%s415_s14] sm:$0xff] %vm434_vm0, %v1435_v39 }
 0x603   : > { %2030 = shalt.err (!%p2027_p9)
}
 0x604   : > { %s2031_s20 = scalar_lea.hbm %s1450_s8, 128  ;;  %s2035_s21 = scalar_lea.hbm %s2482_s7, 256 }
 0x605   : > { %p2032_p10 = scmp.ne.s32.totalorder %s1450_s8, %s2031_s20  ;;  %p2036_p13 = scmp.lt.s32.totalorder %s1450_s8, %s2482_s7 }
 0x606   : > { %p2037_p4 = scmp.lt.s32.totalorder %s2035_s21, %s2031_s20 }
 0x607   : > { %p2033_p12 = pnand %p2032_p10, %p2287_p2 }
 0x608   : > { %p2038_p11 = por %p2037_p4, %p2036_p13 }
 0x609   : > { %p2034_p6 = pneg %p2033_p12 }
 0x60b   : > { %p2039_p1 = pnand %p2038_p11, %p2034_p6 }
 0x60d   : > { %2042 = shalt.err (!%p2039_p1)
}
 0x60e   : > { %1772 = dma.vmem_to_hbm [thread:$0]  (%p2287_p2), %s1453_s5, 128, %s1450_s8, %s1438_s9  }
 0x60f PF: > { %s1464_s23 = sand.u32 1, %s2085_s24   ;;  %p2499_p3 = scmp.ne.s32.totalorder %s2497_s15, 0 }
 0x610   : > { %p2500_p5 = scmp.ge.s32.totalorder %s2105_s29, 2  ;;  %s1465_s30 = scalar_lea.sflag [#allocation5], %s1464_s23 }
 0x612   : > { %p1792_p0 = pnand %p2500_p5, %p2499_p3 }
 0x614   : > { %p1793_p8 = pneg %p1792_p0 }
 0x616   : > { %2080 = dma.done.wait (%p1793_p8), %s1465_s30, 128  }
 0x617   : > { %2082 = vsyncadd (%p1793_p8), %s1465_s30, 4294967168  ;;  %s25_s29 = sadd.s32 1, %s2105_s29   ;;  %s2501_s24 = smov %s2089_s25 }
 0x618   : > { %p22_p7 = scmp.ge.s32.totalorder %s25_s29, 4   ;;  %s2502_s25 = smov %s2093_s26 }
 0x619   : > { %s2503_s26 = smov %s2292_s13  ;;  %s2504_s27 = smov %s2101_s28 }
 0x61a   : > { %s2505_s28 = smov %s2507_s22  ;;  %24 = sbr.rel (!%p22_p7) target bundleno = 13 (0xd), region = 125 }
 0x61f   :  { %1470 = vsyncpa [#allocation4], 1 }
 0x620   :  { %1472 = vsyncpa [#allocation4 + $0x1], 1 }
 0x621   :  { %1473 = vsyncpa [#allocation7], 1 }
 0x622   :  { %1474 = vsyncpa [#allocation10], 1 }
 0x623   :  { %1475 = vsyncpa [#allocation5], 1 }
 0x624   :  { %1477 = vsyncpa [#allocation5 + $0x1], 1 }

</bundles_post_ra>
